<compile_context>
chip_gen: v7x
topology: tpu7x:2x2x1
jax: 0.10.0
libtpu: 0.0.40
codegen_flags: <defaults>
</compile_context>

<pallas_src>
import functools

import jax
import jax.numpy as jnp
from jax.experimental import pallas as pl
from jax.experimental.pallas import tpu as pltpu

EPS = 1e-5
H1, H2 = 64, 32   # hidden sizes of the module


def _nn_ttt_kernel(x_ref, w_ref, v_ref, o_ref):
    """Whole forward pass for one batch tile, resident in VMEM.

    x_ref : (B, num_feature)
    w_ref : (3, 64, 64)  packed weights  [0]=w1 (nf,64), [1]=w2 (64,32), [2]=w3 (32,nc)
    v_ref : (5, 64)      packed vectors  rows: g1, be1, g2(:32), be2(:32), b3(:nc)
    o_ref : (B, num_classes)
    """
    nf = x_ref.shape[1]
    nc = o_ref.shape[1]

    x = x_ref[...].astype(jnp.float32)

    vecs = v_ref[...]
    g1, be1 = vecs[0:1, :], vecs[1:2, :]
    g2, be2 = vecs[2:3, :H2], vecs[3:4, :H2]
    b3 = vecs[4:5, :nc]

    w1 = w_ref[0][:nf, :]          # (nf, 64)
    w2 = w_ref[1][:, :H2]          # (64, 32)
    w3 = w_ref[2][:H2, :nc]        # (32, nc)

    # ---- fc1 (bias cancelled by batch-stat BN) + bn1 + relu ----
    h = jnp.dot(x, w1, preferred_element_type=jnp.float32)
    mu = jnp.mean(h, axis=0, keepdims=True)
    var = jnp.mean(h * h, axis=0, keepdims=True) - mu * mu
    scale = g1 * jax.lax.rsqrt(var + EPS)
    shift = be1 - mu * scale
    h = jnp.maximum(h * scale + shift, 0.0)

    # ---- fc2 (bias cancelled by batch-stat BN) + bn2 + relu ----
    h = jnp.dot(h, w2, preferred_element_type=jnp.float32)
    mu = jnp.mean(h, axis=0, keepdims=True)
    var = jnp.mean(h * h, axis=0, keepdims=True) - mu * mu
    scale = g2 * jax.lax.rsqrt(var + EPS)
    shift = be2 - mu * scale
    h = jnp.maximum(h * scale + shift, 0.0)

    # ---- fc3 ----
    o_ref[...] = (jnp.dot(h, w3, preferred_element_type=jnp.float32)
                  + b3).astype(o_ref.dtype)


@functools.partial(jax.jit, static_argnames=("num_classes",))
def nn_ttt_forward(x, w_pack, vec_pack, *, num_classes):
    """x: (B, num_feature) float32. Returns (B, num_classes) float32."""
    ori_len = x.shape[0]
    if ori_len == 1:                                   # static shape -> python if is fine
        x = jnp.concatenate([x, x], axis=0)
    b, nf = x.shape

    vmem = pl.BlockSpec(memory_space=pltpu.MemorySpace.VMEM)
    flops = 2 * b * (nf * H1 + H1 * H2 + H2 * num_classes)
    bytes_accessed = 4 * (x.size + w_pack.size + vec_pack.size + b * num_classes)

    out = pl.pallas_call(
        _nn_ttt_kernel,
        out_shape=jax.ShapeDtypeStruct((b, num_classes), jnp.float32),
        in_specs=[vmem, vmem, vmem],
        out_specs=vmem,
        cost_estimate=pl.CostEstimate(flops=flops,
                                      transcendentals=0,
                                      bytes_accessed=bytes_accessed),
    )(x, w_pack, vec_pack)
    return out[:ori_len]


def init_params(key, num_feature, num_classes):
    """Deterministic parameter init matching the shapes of NN_ttt.__init__.

    Weights stored transposed vs. PyTorch as (in_features, out_features).
    """
    ks = jax.random.split(key, 8)

    def linear(kw, kb, fan_in, fan_out):
        bound = 1.0 / jnp.sqrt(fan_in)
        w = jax.random.uniform(kw, (fan_in, fan_out), jnp.float32, -bound, bound)
        b = jax.random.uniform(kb, (1, fan_out), jnp.float32, -bound, bound)
        return w, b

    w1, b1 = linear(ks[0], ks[1], num_feature, H1)
    w2, b2 = linear(ks[2], ks[3], H1, H2)
    w3, b3 = linear(ks[4], ks[5], H2, num_classes)

    # BatchNorm affine params (PyTorch default: weight=1, bias=0); deterministic
    # perturbation so the affine path is actually exercised.
    g1 = jnp.ones((1, H1), jnp.float32) + 0.1 * jax.random.normal(ks[6], (1, H1))
    be1 = 0.1 * jax.random.normal(ks[7], (1, H1))
    g2 = jnp.ones((1, H2), jnp.float32) + 0.05 * jnp.arange(H2, dtype=jnp.float32).reshape(1, H2) / H2
    be2 = jnp.zeros((1, H2), jnp.float32)

    return dict(w1=w1, b1=b1, g1=g1, be1=be1,
                w2=w2, b2=b2, g2=g2, be2=be2,
                w3=w3, b3=b3)


def pack_params(params, num_feature, num_classes):
    """Pack weights and vectors into two VMEM-friendly buffers (done once)."""
    w_pack = jnp.zeros((3, H1, H1), jnp.float32)
    w_pack = w_pack.at[0, :num_feature, :H1].set(params["w1"])
    w_pack = w_pack.at[1, :H1, :H2].set(params["w2"])
    w_pack = w_pack.at[2, :H2, :num_classes].set(params["w3"])

    vec_pack = jnp.zeros((5, H1), jnp.float32)
    vec_pack = vec_pack.at[0, :].set(params["g1"][0])
    vec_pack = vec_pack.at[1, :].set(params["be1"][0])
    vec_pack = vec_pack.at[2, :H2].set(params["g2"][0])
    vec_pack = vec_pack.at[3, :H2].set(params["be2"][0])
    vec_pack = vec_pack.at[4, :num_classes].set(params["b3"][0])
    return w_pack, vec_pack


def _reference(x, p):
    """Pure-JAX reference (training-mode BatchNorm1d semantics, WITH fc1/fc2 biases)."""
    ori_len = x.shape[0]
    if ori_len == 1:
        x = jnp.concatenate([x, x], axis=0)

    def bn(h, g, be):
        mu = jnp.mean(h, axis=0, keepdims=True)
        var = jnp.mean((h - mu) ** 2, axis=0, keepdims=True)
        return (h - mu) / jnp.sqrt(var + EPS) * g + be

    h = jax.nn.relu(bn(x @ p["w1"] + p["b1"], p["g1"], p["be1"]))
    h = jax.nn.relu(bn(h @ p["w2"] + p["b2"], p["g2"], p["be2"]))
    return (h @ p["w3"] + p["b3"])[:ori_len]


if __name__ == "__main__":
    num_feature, num_classes, batch = 9, 2, 8   # tic-tac-toe: 9 board cells -> 2 classes

    key = jax.random.PRNGKey(0)
    kx, kp = jax.random.split(key)
    x = jax.random.normal(kx, (batch, num_feature), jnp.float32)
    params = init_params(kp, num_feature, num_classes)
    w_pack, vec_pack = pack_params(params, num_feature, num_classes)

    out = nn_ttt_forward(x, w_pack, vec_pack, num_classes=num_classes)
    out = jax.block_until_ready(out)

    ref = _reference(x, params)
    assert out.shape == (batch, num_classes), out.shape
    assert jnp.allclose(out, ref, atol=2e-4, rtol=2e-4), float(jnp.max(jnp.abs(out - ref)))

    # also exercise the batch-size-1 duplication path of the original forward
    out1 = jax.block_until_ready(
        nn_ttt_forward(x[:1], w_pack, vec_pack, num_classes=num_classes))
    ref1 = _reference(x[:1], params)
    assert out1.shape == (1, num_classes)
    assert jnp.allclose(out1, ref1, atol=2e-4, rtol=2e-4)

    print("KERNEL_OK")
</pallas_src>

<mosaic_0001>
module attributes {stable_mosaic.version = 11 : i64} {
  func.func @_nn_ttt_kernel(%arg0: memref<8x9xf32, #tpu.memory_space<vmem>>, %arg1: memref<3x64x64xf32, #tpu.memory_space<vmem>>, %arg2: memref<5x64xf32, #tpu.memory_space<vmem>>, %arg3: memref<8x2xf32, #tpu.memory_space<vmem>>) attributes {dimension_semantics = [], scalar_prefetch = 0 : i64, scratch_operands = 0 : i64, tpu.core_type = #tpu.core_type<tc>} {
    %c0 = arith.constant 0 : index
    %c0_0 = arith.constant 0 : index
    %0 = vector.load %arg0[%c0, %c0_0] : memref<8x9xf32, #tpu.memory_space<vmem>>, vector<8x9xf32>
    %c0_1 = arith.constant 0 : index
    %c0_2 = arith.constant 0 : index
    %1 = vector.load %arg2[%c0_1, %c0_2] : memref<5x64xf32, #tpu.memory_space<vmem>>, vector<5x64xf32>
    %2 = vector.extract_strided_slice %1 {offsets = [0, 0], sizes = [1, 64], strides = [1, 1]} : vector<5x64xf32> to vector<1x64xf32>
    %3 = vector.extract_strided_slice %1 {offsets = [1, 0], sizes = [1, 64], strides = [1, 1]} : vector<5x64xf32> to vector<1x64xf32>
    %4 = vector.extract_strided_slice %1 {offsets = [2, 0], sizes = [1, 32], strides = [1, 1]} : vector<5x64xf32> to vector<1x32xf32>
    %5 = vector.extract_strided_slice %1 {offsets = [3, 0], sizes = [1, 32], strides = [1, 1]} : vector<5x64xf32> to vector<1x32xf32>
    %6 = vector.extract_strided_slice %1 {offsets = [4, 0], sizes = [1, 2], strides = [1, 1]} : vector<5x64xf32> to vector<1x2xf32>
    %c0_3 = arith.constant 0 : index
    %c0_4 = arith.constant 0 : index
    %c0_5 = arith.constant 0 : index
    %7 = vector.load %arg1[%c0_3, %c0_4, %c0_5] : memref<3x64x64xf32, #tpu.memory_space<vmem>>, vector<1x64x64xf32>
    %8 = vector.shape_cast %7 : vector<1x64x64xf32> to vector<64x64xf32>
    %9 = vector.extract_strided_slice %8 {offsets = [0, 0], sizes = [9, 64], strides = [1, 1]} : vector<64x64xf32> to vector<9x64xf32>
    %c1 = arith.constant 1 : index
    %c0_6 = arith.constant 0 : index
    %c0_7 = arith.constant 0 : index
    %10 = vector.load %arg1[%c1, %c0_6, %c0_7] : memref<3x64x64xf32, #tpu.memory_space<vmem>>, vector<1x64x64xf32>
    %11 = vector.shape_cast %10 : vector<1x64x64xf32> to vector<64x64xf32>
    %12 = vector.extract_strided_slice %11 {offsets = [0, 0], sizes = [64, 32], strides = [1, 1]} : vector<64x64xf32> to vector<64x32xf32>
    %c2 = arith.constant 2 : index
    %c0_8 = arith.constant 0 : index
    %c0_9 = arith.constant 0 : index
    %13 = vector.load %arg1[%c2, %c0_8, %c0_9] : memref<3x64x64xf32, #tpu.memory_space<vmem>>, vector<1x64x64xf32>
    %14 = vector.shape_cast %13 : vector<1x64x64xf32> to vector<64x64xf32>
    %15 = vector.extract_strided_slice %14 {offsets = [0, 0], sizes = [32, 2], strides = [1, 1]} : vector<64x64xf32> to vector<32x2xf32>
    %cst = arith.constant dense<0.000000e+00> : vector<8x64xf32>
    %16 = tpu.matmul %0, %9, %cst {dimension_numbers = #tpu.dot_dimension_numbers<[1], [0], [0], [1], [0, 0, 1, 1], [], []>} : vector<8x9xf32>, vector<9x64xf32>, vector<8x64xf32> -> vector<8x64xf32>
    %cst_10 = arith.constant dense<0.000000e+00> : vector<64xf32>
    %17 = vector.multi_reduction <add>, %16, %cst_10 [0] : vector<8x64xf32> to vector<64xf32>
    %18 = vector.shape_cast %17 : vector<64xf32> to vector<1x64xf32>
    %cst_11 = arith.constant 8.000000e+00 : f32
    %19 = vector.broadcast %cst_11 : f32 to vector<1x64xf32>
    %20 = arith.divf %18, %19 : vector<1x64xf32>
    %21 = arith.mulf %16, %16 : vector<8x64xf32>
    %cst_12 = arith.constant dense<0.000000e+00> : vector<64xf32>
    %22 = vector.multi_reduction <add>, %21, %cst_12 [0] : vector<8x64xf32> to vector<64xf32>
    %23 = vector.shape_cast %22 : vector<64xf32> to vector<1x64xf32>
    %cst_13 = arith.constant 8.000000e+00 : f32
    %24 = vector.broadcast %cst_13 : f32 to vector<1x64xf32>
    %25 = arith.divf %23, %24 : vector<1x64xf32>
    %26 = arith.mulf %20, %20 : vector<1x64xf32>
    %27 = arith.subf %25, %26 : vector<1x64xf32>
    %cst_14 = arith.constant 9.99999974E-6 : f32
    %28 = vector.broadcast %cst_14 : f32 to vector<1x64xf32>
    %29 = arith.addf %27, %28 : vector<1x64xf32>
    %30 = math.rsqrt %29 : vector<1x64xf32>
    %31 = arith.mulf %2, %30 : vector<1x64xf32>
    %32 = arith.mulf %20, %31 : vector<1x64xf32>
    %33 = arith.subf %3, %32 : vector<1x64xf32>
    %34 = vector.broadcast %31 : vector<1x64xf32> to vector<8x64xf32>
    %35 = arith.mulf %16, %34 : vector<8x64xf32>
    %36 = vector.broadcast %33 : vector<1x64xf32> to vector<8x64xf32>
    %37 = arith.addf %35, %36 : vector<8x64xf32>
    %cst_15 = arith.constant 0.000000e+00 : f32
    %38 = vector.broadcast %cst_15 : f32 to vector<8x64xf32>
    %39 = arith.maximumf %37, %38 : vector<8x64xf32>
    %cst_16 = arith.constant dense<0.000000e+00> : vector<8x32xf32>
    %40 = tpu.matmul %39, %12, %cst_16 {dimension_numbers = #tpu.dot_dimension_numbers<[1], [0], [0], [1], [0, 0, 1, 1], [], []>} : vector<8x64xf32>, vector<64x32xf32>, vector<8x32xf32> -> vector<8x32xf32>
    %cst_17 = arith.constant dense<0.000000e+00> : vector<32xf32>
    %41 = vector.multi_reduction <add>, %40, %cst_17 [0] : vector<8x32xf32> to vector<32xf32>
    %42 = vector.shape_cast %41 : vector<32xf32> to vector<1x32xf32>
    %cst_18 = arith.constant 8.000000e+00 : f32
    %43 = vector.broadcast %cst_18 : f32 to vector<1x32xf32>
    %44 = arith.divf %42, %43 : vector<1x32xf32>
    %45 = arith.mulf %40, %40 : vector<8x32xf32>
    %cst_19 = arith.constant dense<0.000000e+00> : vector<32xf32>
    %46 = vector.multi_reduction <add>, %45, %cst_19 [0] : vector<8x32xf32> to vector<32xf32>
    %47 = vector.shape_cast %46 : vector<32xf32> to vector<1x32xf32>
    %cst_20 = arith.constant 8.000000e+00 : f32
    %48 = vector.broadcast %cst_20 : f32 to vector<1x32xf32>
    %49 = arith.divf %47, %48 : vector<1x32xf32>
    %50 = arith.mulf %44, %44 : vector<1x32xf32>
    %51 = arith.subf %49, %50 : vector<1x32xf32>
    %cst_21 = arith.constant 9.99999974E-6 : f32
    %52 = vector.broadcast %cst_21 : f32 to vector<1x32xf32>
    %53 = arith.addf %51, %52 : vector<1x32xf32>
    %54 = math.rsqrt %53 : vector<1x32xf32>
    %55 = arith.mulf %4, %54 : vector<1x32xf32>
    %56 = arith.mulf %44, %55 : vector<1x32xf32>
    %57 = arith.subf %5, %56 : vector<1x32xf32>
    %58 = vector.broadcast %55 : vector<1x32xf32> to vector<8x32xf32>
    %59 = arith.mulf %40, %58 : vector<8x32xf32>
    %60 = vector.broadcast %57 : vector<1x32xf32> to vector<8x32xf32>
    %61 = arith.addf %59, %60 : vector<8x32xf32>
    %cst_22 = arith.constant 0.000000e+00 : f32
    %62 = vector.broadcast %cst_22 : f32 to vector<8x32xf32>
    %63 = arith.maximumf %61, %62 : vector<8x32xf32>
    %cst_23 = arith.constant dense<0.000000e+00> : vector<8x2xf32>
    %64 = tpu.matmul %63, %15, %cst_23 {dimension_numbers = #tpu.dot_dimension_numbers<[1], [0], [0], [1], [0, 0, 1, 1], [], []>} : vector<8x32xf32>, vector<32x2xf32>, vector<8x2xf32> -> vector<8x2xf32>
    %65 = vector.broadcast %6 : vector<1x2xf32> to vector<8x2xf32>
    %66 = arith.addf %64, %65 : vector<8x2xf32>
    %c0_24 = arith.constant 0 : index
    %c0_25 = arith.constant 0 : index
    %67 = vector.load %arg3[%c0_24, %c0_25] : memref<8x2xf32, #tpu.memory_space<vmem>>, vector<8x2xf32>
    tpu.vector_store %arg3[%c0_24, %c0_25], %66 {strides = array<i32>} : memref<8x2xf32, #tpu.memory_space<vmem>>, vector<8x2xf32>,
    return
  }
}

</mosaic_0001>

<bundles_post_ra>
// kernel: nn_ttt_forward.1
= control target key start
LH: loop header
LB: loop body
LE: loop exit
PB: predicated region body
PF: predicated region fallthrough
CT: control target
= control target key end

     0   :  { %8 = vsyncpa [#allocation3], 0  ;;  %s635_s0 = inlined_call_operand.hbm [shape: f32[8,9], index: 0, kind: input, shape index: {}]   ;;  %s636_s1 = inlined_call_operand.hbm [shape: f32[3,64,64], index: 1, kind: input, shape index: {}]   ;;  %s637_s2 = inlined_call_operand.hbm [shape: f32[5,64], index: 2, kind: input, shape index: {}]   ;;  %s638_s3 = inlined_call_operand.vmem [shape: f32[8,2], index: 3, kind: output, shape index: {}]  }
   0x1   :  { %9 = vsyncpa [#allocation5], 0  ;;  %s547_s12 = smov [#allocation4]   ;;  %s477_s16 = scalar_lea.hbm %s636_s1, 3072 }
   0x2   :  { %s25_s13 = sshll.u32 %s547_s12, 4  ;;  %p478_p0 = scmp.ne.s32.totalorder %s636_s1, %s477_s16  ;;  %s26_s13 = int_to_ptr.vmem [resolvable:$true] %s25_s13 }
   0x3   :  { %p481_p1 = scmp.lt.u32.totalorder %s477_s16, %s636_s1 }
   0x5   :  { %p483_p2 = pnand %p481_p1, %p478_p0 }
   0x7   :  { %486 = shalt.err (!%p483_p2)
}
   0x8   :  { %s487_s21 = scalar_lea.vmem %s26_s13, 3072  ;;  %p492_p4 = scmp.lt.s32.totalorder %s26_s13, %s26_s13 }
   0x9   :  { %p488_p3 = scmp.ne.s32.totalorder %s26_s13, %s487_s21  ;;  %p493_p5 = scmp.lt.s32.totalorder %s487_s21, %s487_s21 }
   0xb   :  { %p494_p6 = por %p493_p5, %p492_p4 }
   0xd   :  { %p495_p7 = pnand %p494_p6, %p488_p3 }
   0xf   :  { %498 = shalt.err (!%p495_p7)
}
  0x10   :  { %s548_s22 = smov 128   ;;  %s549_s23 = smov 8  }
  0x11   :  { %31 = dma.hbm_to_vmem [thread:$0]  %s636_s1, 3072, %s26_s13, [#allocation5], %s548_s22, %s548_s22, %s549_s23  }
  0x12   :  { %s550_s26 = smov [#allocation2]   ;;  %s551_s28 = smov [#allocation6]  }
  0x13   :  { %s16_s27 = sshll.u32 %s550_s26, 4  ;;  %s38_s29 = sshll.u32 %s551_s28, 4  ;;  %s17_s27 = int_to_ptr.vmem [resolvable:$true] %s16_s27  ;;  %s39_s29 = int_to_ptr.vmem [resolvable:$true] %s38_s29 }
  0x14   :  { %s499_s5 = scalar_lea.hbm %s635_s0, 128 }
  0x15   :  { %p500_p8 = scmp.ne.s32.totalorder %s635_s0, %s499_s5  ;;  %p503_p9 = scmp.lt.u32.totalorder %s499_s5, %s635_s0 }
  0x17   :  { %p505_p10 = pnand %p503_p9, %p500_p8 }
  0x19   :  { %508 = shalt.err (!%p505_p10)
}
  0x1a   :  { %s509_s1 = scalar_lea.vmem %s17_s27, 128  ;;  %p514_p12 = scmp.lt.s32.totalorder %s17_s27, %s17_s27 }
  0x1b   :  { %p510_p11 = scmp.ne.s32.totalorder %s17_s27, %s509_s1  ;;  %p515_p13 = scmp.lt.s32.totalorder %s509_s1, %s509_s1 }
  0x1d   :  { %p516_p0 = por %p515_p13, %p514_p12 }
  0x1f   :  { %p517_p1 = pnand %p516_p0, %p510_p11 }
  0x21   :  { %520 = shalt.err (!%p517_p1)
}
  0x22   :  { %19 = dma.hbm_to_vmem [thread:$0]  %s635_s0, 128, %s17_s27, [#allocation3]  }
  0x23   :  { %s521_s14 = scalar_lea.hbm %s637_s2, 128 }
  0x24   :  { %p522_p2 = scmp.ne.s32.totalorder %s637_s2, %s521_s14  ;;  %p525_p3 = scmp.lt.u32.totalorder %s521_s14, %s637_s2 }
  0x26   :  { %p527_p4 = pnand %p525_p3, %p522_p2 }
  0x28   :  { %530 = shalt.err (!%p527_p4)
}
  0x29   :  { %s531_s19 = scalar_lea.vmem %s39_s29, 128  ;;  %p536_p6 = scmp.lt.s32.totalorder %s39_s29, %s39_s29 }
  0x2a   :  { %p532_p5 = scmp.ne.s32.totalorder %s39_s29, %s531_s19  ;;  %p537_p7 = scmp.lt.s32.totalorder %s531_s19, %s531_s19 }
  0x2c   :  { %p538_p8 = por %p537_p7, %p536_p6 }
  0x2e   :  { %p539_p9 = pnand %p538_p8, %p532_p5 }
  0x30   :  { %542 = shalt.err (!%p539_p9)
}
  0x31   :  { %41 = dma.hbm_to_vmem [thread:$0]  %s637_s2, 128, %s39_s29, [#allocation5]  }
  0x32   :  { %543 = dma.done.wait [#allocation3], 128  }
  0x33   :  { %544 = vsyncadd [#allocation3], 4294967168 }
  0x34   :  { %545 = dma.done.wait [#allocation5], 3200  }
  0x35   :  { %546 = vsyncadd [#allocation5], 4294964096  ;;  %v552_v0 = vmov 0.0|0.0   ;;  %vm553_vm0 = vmmov 0   ;;  %v554_v1 = vmov 0.0   ;;  %vm73_vm1 = vcmask 1040384  }
  0x36   :  { %442 = vmatprep.subr.bf16.mxu0 %v552_v0  ;;  %446 = vmatprep.subr.bf16.mxu1 %v552_v0  ;;  %v53_v2 = vld [vmem:[#allocation4] sm:$0xff]  ;;  %v54_v3 = vld [vmem:[#allocation4 + $0x8] sm:$0xff]  ;;  %vm555_vm2 = vmmov 1   ;;  %v51_v5 = vld [vmem:[#allocation2] sm:$0xff]  ;;  %vm69_vm4 = vcmask 72704   ;;  %vm147_vm5 = vcmask 523264   ;;  %v176_v40 = vlaneseq }
  0x37   :  { %409 = vmatprep.mubr.msk.f32.mxu0 %vm553_vm0, %v554_v1  ;;  %428 = vmatprep.mubr.msk.f32.mxu1 %vm553_vm0, %v554_v1  ;;  %vm444_vm3 = vmpackc.low %vm73_vm1, %vm555_vm2  ;;  %v443_v4 = vpack.c.bf16 %v54_v3, %v53_v2  ;;  %v56_v6 = vld [vmem:[#allocation4 + $0x40] sm:$0xff]  ;;  %v57_v7 = vld [vmem:[#allocation4 + $0x48] sm:$0xff]  ;;  %vm260_vm6 = vcmask 261120   ;;  %vm376_vm7 = vcmask 15360  }
  0x38   :  { %v447_v8 = vpack.c.bf16 %v57_v7, %v56_v6  ;;  %v58_v9 = vld [vmem:[#allocation4 + $0x50] sm:$0xff]  ;;  %v59_v10 = vld [vmem:[#allocation4 + $0x58] sm:$0xff]  ;;  %v60_v12 = vld [vmem:[#allocation4 + $0x60] sm:$0xff]  ;;  %v620_v41 = vshrl.u32 %v176_v40, 7 }
  0x39   :  { %445 = vmatpush3.bf16.msk.msra.mxu0 %vm444_vm3, %v443_v4  ;;  %v450_v11 = vpack.c.bf16 %v59_v10, %v58_v9  ;;  %v61_v13 = vld [vmem:[#allocation4 + $0x68] sm:$0xff]  ;;  %v62_v15 = vld [vmem:[#allocation4 + $0x70] sm:$0xff]  ;;  %v63_v16 = vld [vmem:[#allocation4 + $0x78] sm:$0xff] }
  0x3a   :  { %458 = vmatprep.subr.bf16.mxu0 %v552_v0  ;;  %448 = vmatpush3.bf16.msra.mxu1 %v447_v8  ;;  %v453_v14 = vpack.c.bf16 %v61_v13, %v60_v12  ;;  %v456_v17 = vpack.c.bf16 %v63_v16, %v62_v15  ;;  %v52_v42 = vld [vmem:[#allocation6] sm:$0x1f]  ;;  %v178_v45 = vsub.s32 0, %v620_v41  ;;  %v183_v49 = vsub.s32 1, %v620_v41  ;;  %v66_v56 = vld [vmem:[#allocation4 + $0x88] sm:$0xff]  ;;  %v67_v58 = vld [vmem:[#allocation4 + $0x90] sm:$0xff] }
  0x3b   :  { %449 = vmatprep.subr.bf16.mxu1 %v552_v0  ;;  %v65_v55 = vld [vmem:[#allocation4 + $0x80] sm:$0xff]  ;;  %v68_v59 = vld [vmem:[#allocation4 + $0x98] sm:$0xff] }
  0x3c   :  { %410 = vmatmul.mubr.msk.f32.vlgmr.msra.gmra.mrb[0].mxu0 %vm69_vm4, %v51_v5  ;;  %v459_v57 = vpack.c.bf16 %v66_v56, %v65_v55  ;;  %v462_v60 = vpack.c.bf16 %v68_v59, %v67_v58 }
  0x3d   :  { %439 = vmatprep.mubr.msk.f32.mxu0 %vm553_vm0, %v554_v1 }
  0x3e   :  { %451 = vmatpush3.bf16.msra.mxu1 %v450_v11  ;;  %460 = vmatpush3.bf16.msra.mxu0 %v459_v57 }
  0x3f   :  { %452 = vmatprep.subr.bf16.mxu1 %v552_v0  ;;  %461 = vmatprep.subr.bf16.mxu0 %v552_v0 }
  0x42   :  { %454 = vmatpush3.bf16.msra.mxu1 %v453_v14  ;;  %463 = vmatpush3.bf16.msra.mxu0 %v462_v60 }
  0x43   :  { %455 = vmatprep.subr.bf16.mxu1 %v552_v0 }
  0x46   :  { %457 = vmatpush3.bf16.msra.mxu1 %v456_v17 }
 0x10f   :  { %v143_v18 = vpop.f32.mrb[0].mxu0 }
 0x110   :  { %v148_v19 = vsel %vm147_vm5, %v143_v18, 0.0  ;;  %v157_v20 = vmul.f32 %v143_v18, %v143_v18  ;;  %v411_v21 = vpop.f32.mrb[1].mxu0 }
 0x111   :  { %v149_v22 = vrot.slane %v148_v19, 4  ;;  %v290_v21 = vsub.s32 2, %v620_v41 }
 0x112   :  { %v158_v23 = vsel %vm147_vm5, %v157_v20, 0.0 }
 0x113   :  { %v150_v24 = vadd.f32 %v149_v22, %v148_v19  ;;  %v159_v25 = vrot.slane %v158_v23, 4 }
 0x115   :  { %v151_v26 = vrot.slane %v150_v24, 2  ;;  %v160_v27 = vadd.f32 %v159_v25, %v158_v23  ;;  %v295_v25 = vsub.s32 3, %v620_v41 }
 0x117   :  { %v152_v28 = vadd.f32 %v151_v26, %v150_v24  ;;  %v161_v29 = vrot.slane %v160_v27, 2 }
 0x119   :  { %v153_v30 = vrot.slane %v152_v28, 1  ;;  %v162_v31 = vadd.f32 %v161_v29, %v160_v27 }
 0x11b   :  { %v154_v32 = vadd.f32 %v153_v30, %v152_v28  ;;  %v163_v33 = vrot.slane %v162_v31, 1 }
 0x11d   :  { %v156_v34 = vmul.f32 0.125, %v154_v32  ;;  %v164_v35 = vadd.f32 %v163_v33, %v162_v31  ;;  %v301_v31 = vsub.s32 4, %v620_v41 }
 0x11f   :  { %v165_v36 = vmul.f32 0.125, %v164_v35  ;;  %v166_v37 = vmul.f32 %v156_v34, %v156_v34  ;;  %v302_v32 = vrot.slane %v52_v42, %v301_v31 }
 0x121   :  { %v167_v38 = vsub.f32 %v165_v36, %v166_v37 }
 0x123   :  { %v168_v39 = vadd.f32 1e-05, %v167_v38 }
 0x125   :  { %473 = vrsqrt.f32 %v168_v39 }
 0x12f   :  { %v474_v43 = vpop.eup %473 }
 0x130   :  { %v170_v44 = vmul.f32 %v474_v43, %v52_v42 }
 0x132   :  { %v171_v46 = vmul.f32 %v170_v44, %v156_v34  ;;  %v179_v48 = vrot.slane %v170_v44, %v178_v45 }
 0x134   :  { %v173_v47 = vrot.slane %v171_v46, 7  ;;  %v180_v51 = vmul.f32 %v179_v48, %v143_v18 }
 0x136   :  { %v175_v50 = vsub.f32 %v52_v42, %v173_v47 }
 0x138   :  { %v184_v52 = vrot.slane %v175_v50, %v183_v49 }
 0x13a   :  { %v185_v53 = vadd.f32 %v184_v52, %v180_v51 }
 0x13c   :  { %v186_v54 = vmax.f32 %v185_v53, 0.0 }
 0x13e   :  { %429 = vmatmul.mubr.msk.f32.vlgmr.msra.gmra.mrb[0].mxu1 %vm147_vm5, %v186_v54 }
 0x211   :  { %v256_v61 = vpop.f32.mrb[0].mxu1 }
 0x212   :  { %v261_v62 = vsel %vm260_vm6, %v256_v61, 0.0  ;;  %v269_v63 = vmul.f32 %v256_v61, %v256_v61  ;;  %v430_v1 = vpop.f32.mrb[1].mxu1 }
 0x213   :  { %v262_v2 = vrot.slane %v261_v62, 4 }
 0x214   :  { %v270_v3 = vsel %vm260_vm6, %v269_v63, 0.0 }
 0x215   :  { %v263_v4 = vadd.f32 %v262_v2, %v261_v62  ;;  %v271_v5 = vrot.slane %v270_v3, 4 }
 0x217   :  { %v264_v6 = vrot.slane %v263_v4, 2  ;;  %v272_v7 = vadd.f32 %v271_v5, %v270_v3 }
 0x219   :  { %v265_v8 = vadd.f32 %v264_v6, %v263_v4  ;;  %v273_v9 = vrot.slane %v272_v7, 2 }
 0x21b   :  { %v266_v0 = vrot.slane %v265_v8, 1  ;;  %v274_v10 = vadd.f32 %v273_v9, %v272_v7 }
 0x21d   :  { %v267_v11 = vadd.f32 %v266_v0, %v265_v8  ;;  %v275_v12 = vrot.slane %v274_v10, 1 }
 0x21f   :  { %v268_v13 = vmul.f32 0.125, %v267_v11  ;;  %v276_v14 = vadd.f32 %v275_v12, %v274_v10 }
 0x221   :  { %v277_v15 = vmul.f32 0.125, %v276_v14  ;;  %v278_v16 = vmul.f32 %v268_v13, %v268_v13 }
 0x223   :  { %v279_v17 = vsub.f32 %v277_v15, %v278_v16 }
 0x225   :  { %v280_v18 = vadd.f32 1e-05, %v279_v17 }
 0x227   :  { %475 = vrsqrt.f32 %v280_v18 }
 0x231   :  { %v476_v19 = vpop.eup %475 }
 0x232   :  { %v282_v20 = vmul.f32 %v476_v19, %v52_v42 }
 0x234   :  { %v283_v22 = vmul.f32 %v282_v20, %v268_v13  ;;  %v291_v24 = vrot.slane %v282_v20, %v290_v21 }
 0x236   :  { %v285_v23 = vrot.slane %v283_v22, 7  ;;  %v292_v27 = vmul.f32 %v291_v24, %v256_v61 }
 0x238   :  { %v287_v26 = vsub.f32 %v52_v42, %v285_v23 }
 0x23a   :  { %v296_v28 = vrot.slane %v287_v26, %v295_v25 }
 0x23c   :  { %v297_v29 = vadd.f32 %v296_v28, %v292_v27 }
 0x23e   :  { %v298_v30 = vmax.f32 %v297_v29, 0.0 }
 0x240   :  { %440 = vmatmul.mubr.msk.f32.vlgmr.msra.gmra.mrb[2].mxu0 %vm260_vm6, %v298_v30 }
 0x313   :  { %v372_v33 = vpop.f32.mrb[2].mxu0 }
 0x314   :  { %v373_v34 = vadd.f32 %v372_v33, %v302_v32  ;;  %v441_v35 = vpop.f32.mrb[3].mxu0 }
 0x316   :  { %377 = vst.msk [vmem:[%s638_s3] sm:$0xff] %vm376_vm7, %v373_v34 }
 0x317   :  { %382 = vsyncpa [#allocation3], 1 }
 0x318   :  { %383 = vsyncpa [#allocation5], 1 }

</bundles_post_ra>
